<compile_context>
chip_gen: v6e
topology: v6e:2x2x1
jax: 0.10.0
libtpu: 0.0.40
codegen_flags: <defaults>
</compile_context>

<pallas_src>
import functools

import jax
import jax.numpy as jnp
from jax.experimental import pallas as pl
from jax.experimental.pallas import tpu as pltpu


# VMEM budget for the pipelined light-field tile buffers (2 x in + 2 x out).  Kept
# conservative so the kernel fits the default scoped VMEM on every generation
# (v5e 16 MiB default is raised to 32 MiB below; v7x has only 64 MiB physical).
_VMEM_TILE_BUDGET_BYTES = 16 * 1024 * 1024
_VMEM_LIMIT_BYTES = 32 * 1024 * 1024


def _round_up(n, m):
    return ((n + m - 1) // m) * m


def _choose_tile_xy(xy, batch, uv, io_bytes, target):
    """Pick the XY (lane) tile width.

    Constraints:
      * multiple of 128 (full, unmasked vector stores),
      * large enough to amortize the ~0.35 us per-grid-step overhead (target ~8192),
      * small enough that 2x(in)+2x(out) double-buffered tiles fit the VMEM budget,
      * leaves >= 2 grid steps over the parallel axes so both v7x TensorCores get work.
    XY is afterwards padded UP to a multiple of the chosen tile (never shrink the tile
    down to a divisor of XY -- that is what used to collapse to 128-wide tiles).
    """
    xy128 = _round_up(xy, 128)
    cap = max(128, (_VMEM_TILE_BUDGET_BYTES // (4 * uv * io_bytes)) // 128 * 128)
    tile = max(128, min(_round_up(target, 128), cap, xy128))
    # v7x megacore: make sure there are at least 2 grid steps across the parallel axes.
    if batch * (-(-xy128 // tile)) < 2:
        tile = max(128, _round_up(-(-xy128 // 2), 128))
    return tile


def _fused_mainnet_kernel(x_ref, bt_ref, o_ref):
    """All MainNet stages on one (UV, TILE_XY) tile of pixels.

    x_ref  : (1, UV, TILE_XY)        light-field tile (angular-major, pixels on lanes)
    bt_ref : (S, UV, UV_PAD) bf16    per-stage fused weights Bt_s = (W @ A_s)^T,
                                     lane-padded to a multiple of 128, single-buffered
    o_ref  : (1, UV, TILE_XY)        updated light-field tile
    """
    uv = x_ref.shape[1]
    n_stage = bt_ref.shape[0]

    # Residual accumulation in f32; only the MXU operands drop to bf16.
    x = x_ref[0].astype(jnp.float32)                       # (UV, TILE_XY)

    def stage(xc, bt_s_padded):
        bt_s = bt_s_padded[:, :uv]                         # strip lane padding -> (UV, UV) bf16
        r = jnp.dot(bt_s, xc.astype(jnp.bfloat16),
                    preferred_element_type=jnp.float32)    # (UV, TILE_XY) f32
        # TODO(synk): keep tanh in f32; switch to bf16 only if profiling shows the EUP
        #             slot binding on v6e/v7x.
        return xc + jnp.tanh(r)

    if n_stage <= 4:
        # Small static unroll: negligible vreg-pressure risk at this stage count.
        for s in range(n_stage):
            x = stage(x, bt_ref[s])
    else:
        # Bounded body for larger cascades (keeps live ranges / spills under control).
        x = jax.lax.fori_loop(0, n_stage, lambda s, xc: stage(xc, bt_ref[s]), x)

    o_ref[0] = x.astype(o_ref.dtype)


def init_params(key, ang_resolution, stage_num):
    """Deterministic parameter construction (shapes follow MainNet.__init__)."""
    uv = ang_resolution * ang_resolution
    k_proj, k_ref = jax.random.split(key)

    # proj_init: Conv2d(1, 7, kernel=(u, v), bias=False), xavier_uniform.
    fan_in = 1 * uv
    fan_out = 7 * uv
    bound = (6.0 / (fan_in + fan_out)) ** 0.5
    proj_w = jax.random.uniform(
        k_proj, (7, 1, ang_resolution, ang_resolution),
        minval=-bound, maxval=bound, dtype=jnp.float32)
    proj_flat = proj_w.reshape(7, uv).T                                   # (UV, 7)

    # Fused [avgpool | proj] weight: column 0 is AvgPool2d(kernel=(u,v)).
    avg_col = jnp.full((uv, 1), 1.0 / uv, dtype=jnp.float32)
    sample_w = jnp.concatenate([avg_col, proj_flat], axis=1)              # (UV, 8)

    # One RefNet surrogate for initialRefnet + one per cascade stage.
    ref_keys = jax.random.split(k_ref, stage_num + 1)
    refnet_a = [
        jax.random.uniform(k, (8, uv), minval=-0.1, maxval=0.1, dtype=jnp.float32)
        for k in ref_keys
    ]
    return {"sample_w": sample_w, "refnet_a": refnet_a}


@functools.partial(jax.jit, static_argnames=("tile_xy_target", "io_dtype"))
def mainnet_forward(noiself, params, epoch, tile_xy_target=8192, io_dtype=jnp.float32):
    """MainNet.forward(noiself, epoch).

    io_dtype controls the dtype of the light field at the pallas_call boundary
    (HBM traffic); use jnp.bfloat16 on memory-bound chips (v5e) if tolerance allows.
    """
    del epoch  # TODO(synk): consumed only by RefNet, which is not in the provided listing.
    b, u, v, x, y = noiself.shape
    uv = u * v
    xy = x * y

    # (b,u,v,x,y) -> (b, u*v, x*y): free reshape, no transpose.  Pixels land on lanes.
    X = noiself.reshape(b, uv, xy).astype(io_dtype)

    # Fused per-stage projections Bt_s = (W @ A_s)^T, stacked (S+1, UV, UV), cast to
    # bf16 (MXU-native everywhere) and lane-padded to a multiple of 128 so the one-time
    # weight DMA / VMEM layout is dense instead of 16/128 masked.
    w = params["sample_w"]                                                # (UV, 8)
    bt = jnp.stack([(w @ a).T for a in params["refnet_a"]], axis=0)       # (S+1, UV, UV)
    bt = bt.astype(jnp.bfloat16)
    n_stage = bt.shape[0]
    uv_pad = _round_up(uv, 128)
    if uv_pad != uv:
        bt = jnp.pad(bt, ((0, 0), (0, 0), (0, uv_pad - uv)))

    # Choose a large lane tile first, then pad XY up to a multiple of it.  Padded zero
    # columns stay zero through every stage (tanh(Bt@0)=0) and are sliced off below.
    io_bytes = jnp.dtype(io_dtype).itemsize
    tile_xy = _choose_tile_xy(xy, b, uv, io_bytes, tile_xy_target)
    xy_pad = _round_up(xy, tile_xy)
    if xy_pad != xy:
        X = jnp.pad(X, ((0, 0), (0, 0), (0, xy_pad - xy)))

    out = pl.pallas_call(
        _fused_mainnet_kernel,
        out_shape=jax.ShapeDtypeStruct((b, uv, xy_pad), io_dtype),
        grid_spec=pltpu.PrefetchScalarGridSpec(
            num_scalar_prefetch=0,
            grid=(b, xy_pad // tile_xy),
            in_specs=[
                # Light-field tile: pipelined (double-buffered) over batch and XY tiles.
                pl.BlockSpec((1, uv, tile_xy), lambda ib, it: (ib, 0, it)),
                # Constant per-stage weights: resident, single-buffered, lane-dense.
                pl.BlockSpec((n_stage, uv, uv_pad), lambda ib, it: (0, 0, 0),
                             pipeline_mode=pl.Buffered(1)),
            ],
            out_specs=pl.BlockSpec((1, uv, tile_xy), lambda ib, it: (ib, 0, it)),
        ),
        compiler_params=pltpu.CompilerParams(
            dimension_semantics=("parallel", "parallel"),
            vmem_limit_bytes=_VMEM_LIMIT_BYTES,
        ),
    )(X, bt)

    if xy_pad != xy:
        out = out[:, :, :xy]
    # (b, u*v, x*y) -> (b, u, v, x, y): free reshape.
    return out.reshape(b, u, v, x, y).astype(noiself.dtype)


def mainnet_reference(noiself, params):
    """Pure-JAX f32 reference of the same cascade (for a bf16 tolerance check)."""
    b, u, v, x, y = noiself.shape
    uv, xy = u * v, x * y
    X = noiself.reshape(b, uv, xy).astype(jnp.float32)
    w = params["sample_w"]
    for a in params["refnet_a"]:
        bt = (w @ a).T
        X = X + jnp.tanh(jnp.einsum("ij,bjk->bik", bt, X))
    return X.reshape(b, u, v, x, y)


if __name__ == "__main__":
    # Small, forward-consistent shapes: opt.angResolution = 4, opt.stageNum = 2.
    ang_resolution = 4
    stage_num = 2
    b, x, y = 2, 16, 16

    key = jax.random.PRNGKey(0)
    k_in, k_par = jax.random.split(key)
    noiself = jax.random.normal(
        k_in, (b, ang_resolution, ang_resolution, x, y), dtype=jnp.float32)
    params = init_params(k_par, ang_resolution, stage_num)

    out = mainnet_forward(noiself, params, epoch=0)
    out = jax.block_until_ready(out)

    assert out.shape == noiself.shape and out.dtype == jnp.float32
    assert bool(jnp.all(jnp.isfinite(out)))

    # bf16-MXU-operand tolerance check against the f32 reference path.
    ref = jax.block_until_ready(mainnet_reference(noiself, params))
    max_err = float(jnp.max(jnp.abs(out - ref)))
    assert max_err < 5e-2, f"bf16 kernel deviates from f32 reference: {max_err}"

    print("KERNEL_OK")
</pallas_src>

<mosaic_0001>
module attributes {stable_mosaic.version = 11 : i64} {
  func.func @_fused_mainnet_kernel(%arg0: i32, %arg1: i32, %arg2: memref<1x16x256xf32, #tpu.memory_space<vmem>>, %arg3: memref<3x16x128xbf16, #tpu.memory_space<vmem>>, %arg4: memref<1x16x256xf32, #tpu.memory_space<vmem>>) attributes {dimension_semantics = [#tpu.dimension_semantics<parallel>, #tpu.dimension_semantics<parallel>], iteration_bounds = array<i64: 2, 1>, scalar_prefetch = 0 : i64, scratch_operands = 0 : i64, tpu.core_type = #tpu.core_type<tc>, window_params = [{transform_indices = @transform_0, window_bounds = array<i64: 1, 16, 256>}, {pipeline_mode = #tpu.pipeline_mode<synchronous>, transform_indices = @transform_1, window_bounds = array<i64: 3, 16, 128>}, {transform_indices = @transform_2, window_bounds = array<i64: 1, 16, 256>}]} {
    %c0 = arith.constant 0 : index
    %c0_0 = arith.constant 0 : index
    %c0_1 = arith.constant 0 : index
    %0 = vector.load %arg2[%c0, %c0_0, %c0_1] : memref<1x16x256xf32, #tpu.memory_space<vmem>>, vector<1x16x256xf32>
    %1 = vector.shape_cast %0 : vector<1x16x256xf32> to vector<16x256xf32>
    %c0_2 = arith.constant 0 : index
    %c0_3 = arith.constant 0 : index
    %c0_4 = arith.constant 0 : index
    %2 = vector.load %arg3[%c0_2, %c0_3, %c0_4] : memref<3x16x128xbf16, #tpu.memory_space<vmem>>, vector<1x16x128xbf16>
    %3 = vector.shape_cast %2 : vector<1x16x128xbf16> to vector<16x128xbf16>
    %4 = vector.extract_strided_slice %3 {offsets = [0, 0], sizes = [16, 16], strides = [1, 1]} : vector<16x128xbf16> to vector<16x16xbf16>
    %5 = arith.truncf %1 : vector<16x256xf32> to vector<16x256xbf16>
    %cst = arith.constant dense<0.000000e+00> : vector<16x256xf32>
    %6 = tpu.matmul %4, %5, %cst {dimension_numbers = #tpu.dot_dimension_numbers<[1], [0], [0], [1], [0, 0, 1, 1], [], []>} : vector<16x16xbf16>, vector<16x256xbf16>, vector<16x256xf32> -> vector<16x256xf32>
    %7 = math.tanh %6 : vector<16x256xf32>
    %8 = arith.addf %1, %7 : vector<16x256xf32>
    %c1 = arith.constant 1 : index
    %c0_5 = arith.constant 0 : index
    %c0_6 = arith.constant 0 : index
    %9 = vector.load %arg3[%c1, %c0_5, %c0_6] : memref<3x16x128xbf16, #tpu.memory_space<vmem>>, vector<1x16x128xbf16>
    %10 = vector.shape_cast %9 : vector<1x16x128xbf16> to vector<16x128xbf16>
    %11 = vector.extract_strided_slice %10 {offsets = [0, 0], sizes = [16, 16], strides = [1, 1]} : vector<16x128xbf16> to vector<16x16xbf16>
    %12 = arith.truncf %8 : vector<16x256xf32> to vector<16x256xbf16>
    %cst_7 = arith.constant dense<0.000000e+00> : vector<16x256xf32>
    %13 = tpu.matmul %11, %12, %cst_7 {dimension_numbers = #tpu.dot_dimension_numbers<[1], [0], [0], [1], [0, 0, 1, 1], [], []>} : vector<16x16xbf16>, vector<16x256xbf16>, vector<16x256xf32> -> vector<16x256xf32>
    %14 = math.tanh %13 : vector<16x256xf32>
    %15 = arith.addf %8, %14 : vector<16x256xf32>
    %c2 = arith.constant 2 : index
    %c0_8 = arith.constant 0 : index
    %c0_9 = arith.constant 0 : index
    %16 = vector.load %arg3[%c2, %c0_8, %c0_9] : memref<3x16x128xbf16, #tpu.memory_space<vmem>>, vector<1x16x128xbf16>
    %17 = vector.shape_cast %16 : vector<1x16x128xbf16> to vector<16x128xbf16>
    %18 = vector.extract_strided_slice %17 {offsets = [0, 0], sizes = [16, 16], strides = [1, 1]} : vector<16x128xbf16> to vector<16x16xbf16>
    %19 = arith.truncf %15 : vector<16x256xf32> to vector<16x256xbf16>
    %cst_10 = arith.constant dense<0.000000e+00> : vector<16x256xf32>
    %20 = tpu.matmul %18, %19, %cst_10 {dimension_numbers = #tpu.dot_dimension_numbers<[1], [0], [0], [1], [0, 0, 1, 1], [], []>} : vector<16x16xbf16>, vector<16x256xbf16>, vector<16x256xf32> -> vector<16x256xf32>
    %21 = math.tanh %20 : vector<16x256xf32>
    %22 = arith.addf %15, %21 : vector<16x256xf32>
    %c0_11 = arith.constant 0 : index
    %c0_12 = arith.constant 0 : index
    %c0_13 = arith.constant 0 : index
    %23 = vector.load %arg4[%c0_11, %c0_12, %c0_13] : memref<1x16x256xf32, #tpu.memory_space<vmem>>, vector<1x16x256xf32>
    %24 = vector.shape_cast %23 : vector<1x16x256xf32> to vector<16x256xf32>
    %25 = vector.shape_cast %22 : vector<16x256xf32> to vector<1x16x256xf32>
    tpu.vector_store %arg4[%c0_11, %c0_12, %c0_13], %25 {strides = array<i32>} : memref<1x16x256xf32, #tpu.memory_space<vmem>>, vector<1x16x256xf32>,
    return
  }
  func.func @transform_0(%arg0: i32, %arg1: i32) -> (i32, i32, i32) {
    %c0_i32 = arith.constant 0 : i32
    %c0_i32_0 = arith.constant 0 : i32
    return %arg0, %c0_i32, %arg1 : i32, i32, i32
  }
  func.func @transform_1(%arg0: i32, %arg1: i32) -> (i32, i32, i32) {
    %c0_i32 = arith.constant 0 : i32
    %c0_i32_0 = arith.constant 0 : i32
    %c0_i32_1 = arith.constant 0 : i32
    %c0_i32_2 = arith.constant 0 : i32
    return %c0_i32, %c0_i32_0, %c0_i32_1 : i32, i32, i32
  }
  func.func @transform_2(%arg0: i32, %arg1: i32) -> (i32, i32, i32) {
    %c0_i32 = arith.constant 0 : i32
    %c0_i32_0 = arith.constant 0 : i32
    return %arg0, %c0_i32, %arg1 : i32, i32, i32
  }
}

</mosaic_0001>

<bundles_post_ra>
// kernel: mainnet_forward.1
= control target key start
LH: loop header
LB: loop body
LE: loop exit
PB: predicated region body
PF: predicated region fallthrough
CT: control target
= control target key end

     0   :  { %s586_s9 = smov 0   ;;  %s588_s10 = smov 0   ;;  %s638_s0 = inlined_call_operand.vmem [shape: f32[2,16,256], index: 0, kind: input, shape index: {}]   ;;  %s639_s1 = inlined_call_operand.vmem [shape: bf16[3,16,128], index: 1, kind: input, shape index: {}]   ;;  %s640_s2 = inlined_call_operand.vmem [shape: f32[2,16,256], index: 2, kind: output, shape index: {}]  }
   0x1   :  { %s590_s11 = smov 0  }
   0x2 LB: > { %s24_s12 = sadd.s32 1, %s564_s10  ;;  %p475_p0 = scmp.ge.s32.totalorder %s568_s11, 1  ;;  %s568_s11 = sphi %s590_s11, %s12_s11   ;;  %s564_s10 = sphi %s588_s10, %s642_s10   ;;  %s560_s9 = sphi %s586_s9, %s641_s9  }
   0x3   : > { %p26_p1 = scmp.ge.s32.totalorder %s24_s12, 2  ;;  %p133_p2 = scmp.lt.s32.totalorder %s568_s11, 3 }
   0x5   : > { %s644_s12 = smov (%p26_p1, %s24_s12), 0  ;;  %p134_p3 = pnand %p475_p0, %p133_p2 }
   0x6   : > { %p164_p4 = scmp.lt.s32.totalorder (!%p134_p3), %s560_s9, 1 }
   0x7   : > { %137 = sbr.rel (%p134_p3) target bundleno = 680 (0x2a8), region = 28 }
   0xc   : > { %v570_v0 = vmov 0   ;;  %s646_s9 = smov (!%p164_p4, %s560_s9), 1  ;;  %v519_v7 = vld [vmem:[%s639_s1] sm:$0xff]   ;;  %vm197_vm0 = vcmask 130048   ;;  %v520_v22 = vld [vmem:[%s639_s1 + $0x8] sm:$0xff]   ;;  %v521_v37 = vld [vmem:[%s639_s1 + $0x10] sm:$0xff]  }
   0xd   : > { %233 = vmatprep.mubr.bf16.mxu0 %v570_v0  ;;  %297 = vmatprep.mubr.bf16.mxu1 %v570_v0  ;;  %s492_s13 = sshll.u32 %s646_s9, 5 }
   0xe   : > { %s171_s16 = scalar_lea.vmem %s638_s0, %s492_s13  ;;  %s181_s25 = scalar_lea.vmem %s640_s2, %s492_s13 }
   0xf   : > { %v185_v1 = vld [vmem:[%s171_s16 + $0x8] sm:$0xff]  ;;  %v187_v2 = vld [vmem:[%s171_s16 + $0x18] sm:$0xff]  ;;  %v184_v3 = vld [vmem:[%s171_s16] sm:$0xff] }
  0x10   : > { %v191_v4 = vpack.c.bf16 %v187_v2, %v185_v1  ;;  %v186_v5 = vld [vmem:[%s171_s16 + $0x10] sm:$0xff] }
  0x11   : > { %v190_v6 = vpack.c.bf16 %v186_v5, %v184_v3 }
  0x12   : > { %215 = vmatprep.subr.bf16.mxu0 %v191_v4 }
  0x13   : > { %216 = vmatpush1.bf16.msra.mxu0 %v190_v6 }
  0x16   : > { %481 = vmatmul.mubr.msk.bf16.vlgmr.msra.gmra.mxu0 %vm197_vm0, %v519_v7 }
  0x17   : > { %361 = vmatprep.mubr.bf16.mxu0 %v570_v0 }
  0xd6   : > { %v235_v8 = vpop.f32.mrf.mxu0 }
  0xd8   : > { %v237_v9 = vpop.f32.mrf.mxu0 }
  0xd9   : > { %522 = vtanh.f32 %v237_v9 }
  0xda   : > { %v239_v10 = vpop.f32.mrf.mxu0 }
  0xdb   : > { %524 = vtanh.f32 %v239_v10 }
  0xdc   : > { %526 = vtanh.f32 %v235_v8  ;;  %v241_v11 = vpop.f32.mrf.mxu0 }
  0xdd   : > { %528 = vtanh.f32 %v241_v11 }
  0xe6   : > { %v523_v12 = vpop.eup %522 }
  0xe7   : > { %v249_v17 = vadd.f32 %v523_v12, %v185_v1 }
  0xe8   : > { %v525_v13 = vpop.eup %524 }
  0xe9   : > { %v527_v14 = vpop.eup %526  ;;  %v250_v16 = vadd.f32 %v525_v13, %v186_v5 }
  0xea   : > { %v529_v15 = vpop.eup %528  ;;  %v248_v19 = vadd.f32 %v527_v14, %v184_v3 }
  0xeb   : > { %v251_v18 = vadd.f32 %v529_v15, %v187_v2 }
  0xec   : > { %v255_v21 = vpack.c.bf16 %v250_v16, %v248_v19 }
  0xed   : > { %v256_v20 = vpack.c.bf16 %v251_v18, %v249_v17 }
  0xef   : > { %279 = vmatprep.subr.bf16.mxu1 %v256_v20 }
  0xf0   : > { %280 = vmatpush1.bf16.msra.mxu1 %v255_v21 }
  0xf3   : > { %485 = vmatmul.mubr.msk.bf16.vlgmr.msra.gmra.mxu1 %vm197_vm0, %v520_v22 }
 0x1b3   : > { %v299_v23 = vpop.f32.mrf.mxu1 }
 0x1b5   : > { %v301_v24 = vpop.f32.mrf.mxu1 }
 0x1b6   : > { %530 = vtanh.f32 %v301_v24 }
 0x1b7   : > { %v303_v25 = vpop.f32.mrf.mxu1 }
 0x1b8   : > { %532 = vtanh.f32 %v303_v25 }
 0x1b9   : > { %534 = vtanh.f32 %v299_v23  ;;  %v305_v26 = vpop.f32.mrf.mxu1 }
 0x1ba   : > { %536 = vtanh.f32 %v305_v26 }
 0x1c3   : > { %v531_v27 = vpop.eup %530 }
 0x1c4   : > { %v313_v32 = vadd.f32 %v531_v27, %v249_v17 }
 0x1c5   : > { %v533_v28 = vpop.eup %532 }
 0x1c6   : > { %v535_v29 = vpop.eup %534  ;;  %v314_v31 = vadd.f32 %v533_v28, %v250_v16 }
 0x1c7   : > { %v537_v30 = vpop.eup %536  ;;  %v312_v34 = vadd.f32 %v535_v29, %v248_v19 }
 0x1c8   : > { %v315_v33 = vadd.f32 %v537_v30, %v251_v18 }
 0x1c9   : > { %v319_v36 = vpack.c.bf16 %v314_v31, %v312_v34 }
 0x1ca   : > { %v320_v35 = vpack.c.bf16 %v315_v33, %v313_v32 }
 0x1cc   : > { %343 = vmatprep.subr.bf16.mxu0 %v320_v35 }
 0x1cd   : > { %344 = vmatpush1.bf16.msra.mxu0 %v319_v36 }
 0x1d0   : > { %489 = vmatmul.mubr.msk.bf16.vlgmr.msra.gmra.mxu0 %vm197_vm0, %v521_v37 }
 0x290   : > { %v363_v38 = vpop.f32.mrf.mxu0 }
 0x291   : > { %538 = vtanh.f32 %v363_v38 }
 0x292   : > { %v365_v39 = vpop.f32.mrf.mxu0 }
 0x293   : > { %540 = vtanh.f32 %v365_v39 }
 0x294   : > { %v367_v40 = vpop.f32.mrf.mxu0 }
 0x295   : > { %542 = vtanh.f32 %v367_v40 }
 0x296   : > { %v369_v41 = vpop.f32.mrf.mxu0 }
 0x297   : > { %544 = vtanh.f32 %v369_v41 }
 0x29e   : > { %v539_v42 = vpop.eup %538 }
 0x29f   : > { %v376_v43 = vadd.f32 %v539_v42, %v312_v34 }
 0x2a0   : > { %v541_v44 = vpop.eup %540 }
 0x2a1   : > { %380 = vst [vmem:[%s181_s25] sm:$0xff] %v376_v43  ;;  %v377_v45 = vadd.f32 %v541_v44, %v313_v32 }
 0x2a2   : > { %v543_v46 = vpop.eup %542 }
 0x2a3   : > { %381 = vst [vmem:[%s181_s25 + $0x8] sm:$0xff] %v377_v45  ;;  %v378_v47 = vadd.f32 %v543_v46, %v314_v31 }
 0x2a4   : > { %v545_v48 = vpop.eup %544 }
 0x2a5   : > { %382 = vst [vmem:[%s181_s25 + $0x10] sm:$0xff] %v378_v47  ;;  %v379_v49 = vadd.f32 %v545_v48, %v315_v33 }
 0x2a7   : > { %383 = vst [vmem:[%s181_s25 + $0x18] sm:$0xff] %v379_v49 }
 0x2a8 PF: > { %s12_s11 = sadd.s32 1, %s568_s11   ;;  %s641_s9 = smov %s564_s10 }
 0x2a9   : > { %p9_p5 = scmp.ge.s32.totalorder %s12_s11, 4   ;;  %s642_s10 = smov %s644_s12 }
 0x2ab   :  { %11 = sbr.rel (!%p9_p5) target bundleno = 2 (0x2), region = 60 }

</bundles_post_ra>
